<compile_context>
chip_gen: v7x
topology: tpu7x:2x2x1
jax: 0.10.0
libtpu: 0.0.40
codegen_flags: <defaults>
</compile_context>

<pallas_src>
import jax
import jax.numpy as jnp
from jax.experimental import pallas as pl
from jax.experimental.pallas import tpu as pltpu


def _round_up(x, m):
    return ((x + m - 1) // m) * m


def _mlp_kernel(xrow_ref, eattr_ref, w1a_ref, w1b_ref, b1_ref, w2_ref, b2_ref,
                out_ref):
    # xrow_ref/eattr_ref: (TE, F) bf16    w1a/w1b: (F, Hp) bf16
    # b1: (1, Hp) f32    w2: (Hp, 128) bf16    b2: (1, 128) f32
    # out_ref: (TE, 128) f32
    h = (jnp.dot(xrow_ref[...], w1a_ref[...],
                 preferred_element_type=jnp.float32)
         + jnp.dot(eattr_ref[...], w1b_ref[...],
                   preferred_element_type=jnp.float32)
         + b1_ref[...])
    h = jnp.maximum(h, 0.0)                       # f32 epilogue (v5e-safe)
    y = jnp.dot(h.astype(w2_ref.dtype), w2_ref[...],
                preferred_element_type=jnp.float32) + b2_ref[...]
    out_ref[...] = y.astype(out_ref.dtype)


def node_mlp_pallas(x_row, edge_attr, w1a, w1b, b1, w2, b2, *, tile_e=1024):
    """Fused (split-Linear -> ReLU -> Linear) over edge rows, tiled along E."""
    E, F = x_row.shape
    Hp = w1a.shape[1]
    out_dim = w2.shape[1]

    # Big tiles amortize the per-step grid overhead; cap at the 8-row-aligned
    # problem size so tiny problems don't allocate oversized VMEM buffers.
    tile_e = max(8, min(_round_up(tile_e, 8), _round_up(E, 8)))
    grid = (pl.cdiv(E, tile_e),)

    itemsize_in = jnp.dtype(x_row.dtype).itemsize
    weight_bytes = sum(int(a.size) * jnp.dtype(a.dtype).itemsize
                       for a in (w1a, w1b, b1, w2, b2))
    cost = pl.CostEstimate(
        flops=int(2 * E * (2 * F * Hp + Hp * out_dim)),
        transcendentals=0,
        bytes_accessed=int(E * 2 * F * itemsize_in      # x_row + edge_attr
                           + E * out_dim * 4            # f32 output
                           + weight_bytes),
    )

    return pl.pallas_call(
        _mlp_kernel,
        out_shape=jax.ShapeDtypeStruct((E, out_dim), jnp.float32),
        grid_spec=pltpu.PrefetchScalarGridSpec(
            num_scalar_prefetch=0,
            grid=grid,
            in_specs=[
                pl.BlockSpec((tile_e, F), lambda i: (i, 0)),     # x[row] tile
                pl.BlockSpec((tile_e, F), lambda i: (i, 0)),     # edge_attr tile
                pl.BlockSpec((F, Hp), lambda i: (0, 0)),         # W1a (resident)
                pl.BlockSpec((F, Hp), lambda i: (0, 0)),         # W1b (resident)
                pl.BlockSpec((1, Hp), lambda i: (0, 0)),         # b1
                pl.BlockSpec((Hp, out_dim), lambda i: (0, 0)),   # W2 (resident)
                pl.BlockSpec((1, out_dim), lambda i: (0, 0)),    # b2
            ],
            out_specs=pl.BlockSpec((tile_e, out_dim), lambda i: (i, 0)),
        ),
        compiler_params=pltpu.CompilerParams(
            dimension_semantics=("parallel",)),
        cost_estimate=cost,
    )(x_row, edge_attr, w1a, w1b, b1, w2, b2)


class NodeModelPallas:
    """JAX/Pallas port of NodeModel.  edge_features_in must equal
    num_features_in (required for the 2*num_features_in Linear to type-check,
    exactly as in the PyTorch module)."""

    def __init__(self, num_features_in, edge_features_in, hidden, key):
        assert edge_features_in == num_features_in
        self.F = num_features_in
        in_dim = 2 * num_features_in
        out_dim = 128  # hard-coded in the PyTorch module
        k1, k2, k3, k4 = jax.random.split(key, 4)

        # PyTorch Linear default init: U(-1/sqrt(fan_in), 1/sqrt(fan_in)).
        lim1 = 1.0 / jnp.sqrt(in_dim)
        lim2 = 1.0 / jnp.sqrt(hidden)
        # Reference (f32, unpadded) parameters, stored transposed: (in, out).
        self.w1 = jax.random.uniform(k1, (in_dim, hidden), jnp.float32, -lim1, lim1)
        self.b1 = jax.random.uniform(k2, (1, hidden), jnp.float32, -lim1, lim1)
        self.w2 = jax.random.uniform(k3, (hidden, out_dim), jnp.float32, -lim2, lim2)
        self.b2 = jax.random.uniform(k4, (1, out_dim), jnp.float32, -lim2, lim2)

        # Kernel-side parameters: W1 split per input stream, hidden zero-padded
        # to a lane-dense multiple of 128, matmul operands cast to bf16.
        Hp = max(128, _round_up(hidden, 128))
        pad_h = Hp - hidden
        w1a = jnp.pad(self.w1[:num_features_in], ((0, 0), (0, pad_h)))
        w1b = jnp.pad(self.w1[num_features_in:], ((0, 0), (0, pad_h)))
        b1p = jnp.pad(self.b1, ((0, 0), (0, pad_h)))          # padded cols = 0
        w2p = jnp.pad(self.w2, ((0, pad_h), (0, 0)))          # padded rows = 0
        self.w1a_k = w1a.astype(jnp.bfloat16)
        self.w1b_k = w1b.astype(jnp.bfloat16)
        self.b1_k = b1p                                       # f32 bias
        self.w2_k = w2p.astype(jnp.bfloat16)
        self.b2_k = self.b2                                   # f32 bias

    def __call__(self, x, edge_index, edge_attr, u=None, batch=None,
                 tile_e=1024):
        row = edge_index[0]
        # Gather (plain-JAX glue), matches x[row]; the concat is fused into the
        # kernel via the split W1 — no [E, 2F] buffer ever hits HBM.
        x_row = x[row].astype(jnp.bfloat16)
        eattr = edge_attr.astype(jnp.bfloat16)
        return node_mlp_pallas(x_row, eattr, self.w1a_k, self.w1b_k, self.b1_k,
                               self.w2_k, self.b2_k, tile_e=tile_e)


def _reference(model, x, edge_index, edge_attr):
    # Pure-f32 reference of the PyTorch forward.
    row = edge_index[0]
    out = jnp.concatenate([x[row], edge_attr], axis=1)
    h = jnp.maximum(out @ model.w1 + model.b1, 0.0)
    return h @ model.w2 + model.b2


if __name__ == "__main__":
    key = jax.random.PRNGKey(0)
    k_x, k_e, k_idx, k_p = jax.random.split(key, 4)

    N = 16           # number of nodes
    F = 8            # num_features_in == edge_features_in
    E = 36           # number of edges (not a tile multiple -> partial last tile)
    HIDDEN = 128     # hidden width of first Linear (matches module's global)

    x = jax.random.normal(k_x, (N, F), jnp.float32)
    edge_attr = jax.random.normal(k_e, (E, F), jnp.float32)
    row = jax.random.randint(k_idx, (E,), 0, N)
    col = (row + 1) % N
    edge_index = jnp.stack([row, col], axis=0)          # [2, E]
    u = None
    batch = jnp.zeros((N,), jnp.int32)

    model = NodeModelPallas(F, F, HIDDEN, k_p)
    out = model(x, edge_index, edge_attr, u, batch)
    out = jax.block_until_ready(out)

    ref = _reference(model, x, edge_index, edge_attr)
    assert out.shape == (E, 128), out.shape
    # bf16 matmul operands with f32 accumulation -> loosened tolerance.
    assert jnp.allclose(out, ref, atol=5e-2, rtol=5e-2), (
        "mismatch vs reference: max abs err = "
        f"{float(jnp.max(jnp.abs(out - ref)))}")

    print("KERNEL_OK")
</pallas_src>

<mosaic_0001>
module attributes {stable_mosaic.version = 11 : i64} {
  func.func @_mlp_kernel(%arg0: i32, %arg1: memref<40x8xbf16, #tpu.memory_space<vmem>>, %arg2: memref<40x8xbf16, #tpu.memory_space<vmem>>, %arg3: memref<8x128xbf16, #tpu.memory_space<vmem>>, %arg4: memref<8x128xbf16, #tpu.memory_space<vmem>>, %arg5: memref<1x128xf32, #tpu.memory_space<vmem>>, %arg6: memref<128x128xbf16, #tpu.memory_space<vmem>>, %arg7: memref<1x128xf32, #tpu.memory_space<vmem>>, %arg8: memref<40x128xf32, #tpu.memory_space<vmem>>) attributes {dimension_semantics = [#tpu.dimension_semantics<parallel>], iteration_bounds = array<i64: 1>, scalar_prefetch = 0 : i64, scratch_operands = 0 : i64, tpu.core_type = #tpu.core_type<tc>, window_params = [{transform_indices = @transform_0, window_bounds = array<i64: 40, 8>}, {transform_indices = @transform_1, window_bounds = array<i64: 40, 8>}, {pipeline_mode = #tpu.pipeline_mode<synchronous>, transform_indices = @transform_2, window_bounds = array<i64: 8, 128>}, {pipeline_mode = #tpu.pipeline_mode<synchronous>, transform_indices = @transform_3, window_bounds = array<i64: 8, 128>}, {pipeline_mode = #tpu.pipeline_mode<synchronous>, transform_indices = @transform_4, window_bounds = array<i64: 1, 128>}, {pipeline_mode = #tpu.pipeline_mode<synchronous>, transform_indices = @transform_5, window_bounds = array<i64: 128, 128>}, {pipeline_mode = #tpu.pipeline_mode<synchronous>, transform_indices = @transform_6, window_bounds = array<i64: 1, 128>}, {transform_indices = @transform_7, window_bounds = array<i64: 40, 128>}]} {
    %c0 = arith.constant 0 : index
    %c0_0 = arith.constant 0 : index
    %0 = vector.load %arg1[%c0, %c0_0] : memref<40x8xbf16, #tpu.memory_space<vmem>>, vector<40x8xbf16>
    %c0_1 = arith.constant 0 : index
    %c0_2 = arith.constant 0 : index
    %1 = vector.load %arg3[%c0_1, %c0_2] : memref<8x128xbf16, #tpu.memory_space<vmem>>, vector<8x128xbf16>
    %cst = arith.constant dense<0.000000e+00> : vector<40x128xf32>
    %2 = tpu.matmul %0, %1, %cst {dimension_numbers = #tpu.dot_dimension_numbers<[1], [0], [0], [1], [0, 0, 1, 1], [], []>} : vector<40x8xbf16>, vector<8x128xbf16>, vector<40x128xf32> -> vector<40x128xf32>
    %c0_3 = arith.constant 0 : index
    %c0_4 = arith.constant 0 : index
    %3 = vector.load %arg2[%c0_3, %c0_4] : memref<40x8xbf16, #tpu.memory_space<vmem>>, vector<40x8xbf16>
    %c0_5 = arith.constant 0 : index
    %c0_6 = arith.constant 0 : index
    %4 = vector.load %arg4[%c0_5, %c0_6] : memref<8x128xbf16, #tpu.memory_space<vmem>>, vector<8x128xbf16>
    %cst_7 = arith.constant dense<0.000000e+00> : vector<40x128xf32>
    %5 = tpu.matmul %3, %4, %cst_7 {dimension_numbers = #tpu.dot_dimension_numbers<[1], [0], [0], [1], [0, 0, 1, 1], [], []>} : vector<40x8xbf16>, vector<8x128xbf16>, vector<40x128xf32> -> vector<40x128xf32>
    %6 = arith.addf %2, %5 : vector<40x128xf32>
    %c0_8 = arith.constant 0 : index
    %c0_9 = arith.constant 0 : index
    %7 = vector.load %arg5[%c0_8, %c0_9] : memref<1x128xf32, #tpu.memory_space<vmem>>, vector<1x128xf32>
    %8 = vector.broadcast %7 : vector<1x128xf32> to vector<40x128xf32>
    %9 = arith.addf %6, %8 : vector<40x128xf32>
    %cst_10 = arith.constant 0.000000e+00 : f32
    %10 = vector.broadcast %cst_10 : f32 to vector<40x128xf32>
    %11 = arith.maximumf %9, %10 : vector<40x128xf32>
    %12 = arith.truncf %11 : vector<40x128xf32> to vector<40x128xbf16>
    %c0_11 = arith.constant 0 : index
    %c0_12 = arith.constant 0 : index
    %13 = vector.load %arg6[%c0_11, %c0_12] : memref<128x128xbf16, #tpu.memory_space<vmem>>, vector<128x128xbf16>
    %cst_13 = arith.constant dense<0.000000e+00> : vector<40x128xf32>
    %14 = tpu.matmul %12, %13, %cst_13 {dimension_numbers = #tpu.dot_dimension_numbers<[1], [0], [0], [1], [0, 0, 1, 1], [], []>} : vector<40x128xbf16>, vector<128x128xbf16>, vector<40x128xf32> -> vector<40x128xf32>
    %c0_14 = arith.constant 0 : index
    %c0_15 = arith.constant 0 : index
    %15 = vector.load %arg7[%c0_14, %c0_15] : memref<1x128xf32, #tpu.memory_space<vmem>>, vector<1x128xf32>
    %16 = vector.broadcast %15 : vector<1x128xf32> to vector<40x128xf32>
    %17 = arith.addf %14, %16 : vector<40x128xf32>
    %c0_16 = arith.constant 0 : index
    %c0_17 = arith.constant 0 : index
    %18 = vector.load %arg8[%c0_16, %c0_17] : memref<40x128xf32, #tpu.memory_space<vmem>>, vector<40x128xf32>
    tpu.vector_store %arg8[%c0_16, %c0_17], %17 {strides = array<i32>} : memref<40x128xf32, #tpu.memory_space<vmem>>, vector<40x128xf32>,
    return
  }
  func.func @transform_0(%arg0: i32) -> (i32, i32) {
    %c0_i32 = arith.constant 0 : i32
    %c0_i32_0 = arith.constant 0 : i32
    return %arg0, %c0_i32 : i32, i32
  }
  func.func @transform_1(%arg0: i32) -> (i32, i32) {
    %c0_i32 = arith.constant 0 : i32
    %c0_i32_0 = arith.constant 0 : i32
    return %arg0, %c0_i32 : i32, i32
  }
  func.func @transform_2(%arg0: i32) -> (i32, i32) {
    %c0_i32 = arith.constant 0 : i32
    %c0_i32_0 = arith.constant 0 : i32
    %c0_i32_1 = arith.constant 0 : i32
    return %c0_i32, %c0_i32_0 : i32, i32
  }
  func.func @transform_3(%arg0: i32) -> (i32, i32) {
    %c0_i32 = arith.constant 0 : i32
    %c0_i32_0 = arith.constant 0 : i32
    %c0_i32_1 = arith.constant 0 : i32
    return %c0_i32, %c0_i32_0 : i32, i32
  }
  func.func @transform_4(%arg0: i32) -> (i32, i32) {
    %c0_i32 = arith.constant 0 : i32
    %c0_i32_0 = arith.constant 0 : i32
    %c0_i32_1 = arith.constant 0 : i32
    return %c0_i32, %c0_i32_0 : i32, i32
  }
  func.func @transform_5(%arg0: i32) -> (i32, i32) {
    %c0_i32 = arith.constant 0 : i32
    %c0_i32_0 = arith.constant 0 : i32
    %c0_i32_1 = arith.constant 0 : i32
    return %c0_i32, %c0_i32_0 : i32, i32
  }
  func.func @transform_6(%arg0: i32) -> (i32, i32) {
    %c0_i32 = arith.constant 0 : i32
    %c0_i32_0 = arith.constant 0 : i32
    %c0_i32_1 = arith.constant 0 : i32
    return %c0_i32, %c0_i32_0 : i32, i32
  }
  func.func @transform_7(%arg0: i32) -> (i32, i32) {
    %c0_i32 = arith.constant 0 : i32
    %c0_i32_0 = arith.constant 0 : i32
    return %arg0, %c0_i32 : i32, i32
  }
}

</mosaic_0001>

<bundles_post_ra>
// kernel: tpu_custom_call.1
= control target key start
LH: loop header
LB: loop body
LE: loop exit
PB: predicated region body
PF: predicated region fallthrough
CT: control target
= control target key end

     0   :  { %12 = vsyncpa [#allocation3], 0  ;;  %s777_s0 = inlined_call_operand.vmem [shape: bf16[36,8], index: 0, kind: input, shape index: {}]   ;;  %s778_s1 = inlined_call_operand.vmem [shape: bf16[36,8], index: 1, kind: input, shape index: {}]   ;;  %s779_s2 = inlined_call_operand.hbm [shape: bf16[8,128], index: 2, kind: input, shape index: {}]   ;;  %s780_s3 = inlined_call_operand.hbm [shape: bf16[8,128], index: 3, kind: input, shape index: {}]   ;;  %s781_s4 = inlined_call_operand.vmem [shape: f32[1,128], index: 4, kind: input, shape index: {}]   ;;  %s782_s5 = inlined_call_operand.vmem [shape: bf16[128,128], index: 5, kind: input, shape index: {}]   ;;  %s783_s6 = inlined_call_operand.vmem [shape: f32[1,128], index: 6, kind: input, shape index: {}]   ;;  %s784_s7 = inlined_call_operand.hbm [shape: f32[36,128], index: 7, kind: output, shape index: {}]  }
   0x1   :  { %13 = vsyncpa [#allocation6], 0 }
   0x2   :  { %14 = vsyncpa [#allocation4], 0  ;;  %s604_s24 = smov [#allocation2]   ;;  %s605_s26 = smov [#allocation5]  }
   0x3   :  { %s25_s25 = sshll.u32 %s604_s24, 4  ;;  %s35_s27 = sshll.u32 %s605_s26, 4  ;;  %s26_s25 = int_to_ptr.vmem [resolvable:$true] %s25_s25  ;;  %s36_s27 = int_to_ptr.vmem [resolvable:$true] %s35_s27 }
   0x4   :  { %s532_s30 = scalar_lea.hbm %s779_s2, 64 }
   0x5   :  { %p533_p0 = scmp.ne.s32.totalorder %s779_s2, %s532_s30  ;;  %p536_p1 = scmp.lt.u32.totalorder %s532_s30, %s779_s2 }
   0x7   :  { %p538_p2 = pnand %p536_p1, %p533_p0 }
   0x9   :  { %541 = shalt.err (!%p538_p2)
}
   0xa   :  { %s542_s12 = scalar_lea.vmem %s26_s25, 64  ;;  %p547_p4 = scmp.lt.s32.totalorder %s26_s25, %s26_s25 }
   0xb   :  { %p543_p3 = scmp.ne.s32.totalorder %s26_s25, %s542_s12  ;;  %p548_p5 = scmp.lt.s32.totalorder %s542_s12, %s542_s12 }
   0xd   :  { %p549_p6 = por %p548_p5, %p547_p4 }
   0xf   :  { %p550_p7 = pnand %p549_p6, %p543_p3 }
  0x11   :  { %553 = shalt.err (!%p550_p7)
}
  0x12   :  { %28 = dma.hbm_to_vmem [thread:$0]  %s779_s2, 64, %s26_s25, [#allocation3]  }
  0x13   :  { %s554_s17 = scalar_lea.hbm %s780_s3, 64 }
  0x14   :  { %p555_p8 = scmp.ne.s32.totalorder %s780_s3, %s554_s17  ;;  %p558_p9 = scmp.lt.u32.totalorder %s554_s17, %s780_s3 }
  0x16   :  { %p560_p10 = pnand %p558_p9, %p555_p8 }
  0x18   :  { %563 = shalt.err (!%p560_p10)
}
  0x19   :  { %s564_s22 = scalar_lea.vmem %s36_s27, 64  ;;  %p569_p12 = scmp.lt.s32.totalorder %s36_s27, %s36_s27 }
  0x1a   :  { %p565_p11 = scmp.ne.s32.totalorder %s36_s27, %s564_s22  ;;  %p570_p13 = scmp.lt.s32.totalorder %s564_s22, %s564_s22 }
  0x1c   :  { %p571_p0 = por %p570_p13, %p569_p12 }
  0x1e   :  { %p572_p1 = pnand %p571_p0, %p565_p11 }
  0x20   :  { %575 = shalt.err (!%p572_p1)
}
  0x21   :  { %38 = dma.hbm_to_vmem [thread:$0]  %s780_s3, 64, %s36_s27, [#allocation6]  }
  0x22   :  { %598 = dma.done.wait [#allocation3], 64  }
  0x23   :  { %599 = vsyncadd [#allocation3], 4294967232 }
  0x24   :  { %600 = dma.done.wait [#allocation6], 64  }
  0x25   :  { %601 = vsyncadd [#allocation6], 4294967232  ;;  %v606_v0 = vmov 0.0   ;;  %vm607_vm0 = vmmov 0   ;;  %vm87_vm1 = vcmask 1043456   ;;  %vm77_vm2 = vcmask 64512  }
  0x26   :  { %439 = vmatprep.subr.bf16.mxu0 %v606_v0  ;;  %453 = vmatprep.subr.bf16.mxu1 %v606_v0  ;;  %v63_v1 = vld [vmem:[#allocation5] sm:$0xf]  ;;  %v57_v2 = vld [vmem:[#allocation2] sm:$0xf]  ;;  %v518_v5 = vld [vmem:[%s778_s1] sm:$0xff]   ;;  %s608_s26 = smov [#allocation7]  }
  0x27   :  { %441 = vmatprep.mubr.msk.bf16.mxu0 %vm607_vm0, %v606_v0  ;;  %455 = vmatprep.mubr.msk.bf16.mxu1 %vm607_vm0, %v606_v0  ;;  %v89_v3 = vsel %vm87_vm1, %v63_v1, 0  ;;  %v170_v4 = vsel %vm87_vm1, %v57_v2, 0  ;;  %v519_v6 = vld [vmem:[%s777_s0] sm:$0xff]   ;;  %v520_v8 = vld [vmem:[%s778_s1 + $0x8] sm:$0xff]   ;;  %v526_v11 = vld [vmem:[%s782_s5 + $0x10] sm:$0xff]   ;;  %s385_s27 = sshll.u32 %s608_s26, 4  ;;  %s386_s27 = int_to_ptr.vmem [resolvable:$true] %s385_s27 }
  0x28   :  { %440 = vmatpush3.bf16.msra.mxu0 %v89_v3  ;;  %454 = vmatpush3.bf16.msra.mxu1 %v170_v4  ;;  %v524_v7 = vld [vmem:[%s782_s5] sm:$0xff]   ;;  %v525_v9 = vld [vmem:[%s782_s5 + $0x8] sm:$0xff]   ;;  %v527_v12 = vld [vmem:[%s782_s5 + $0x18] sm:$0xff]   ;;  %p581_p3 = scmp.lt.s32.totalorder %s386_s27, %s386_s27 }
  0x29   :  { %467 = vmatprep.subr.bf16.mxu0 %v606_v0  ;;  %495 = vmatprep.subr.bf16.mxu1 %v606_v0  ;;  %v521_v10 = vld [vmem:[%s777_s0 + $0x8] sm:$0xff]   ;;  %v522_v13 = vld [vmem:[%s778_s1 + $0x10] ss:$0 sps:$4 sm:$0xff]   ;;  %v528_v15 = vld [vmem:[%s782_s5 + $0x20] sm:$0xff]  }
  0x2a   :  { %v523_v14 = vld [vmem:[%s777_s0 + $0x10] ss:$0 sps:$4 sm:$0xff]   ;;  %v529_v16 = vld [vmem:[%s782_s5 + $0x28] sm:$0xff]   ;;  %v531_v18 = vld [vmem:[%s782_s5 + $0x38] sm:$0xff]  }
  0x2b   :  { %442 = vmatmul.mubr.msk.bf16.vlgmr.msra.gmra.mrb[0].mxu0 %vm77_vm2, %v518_v5  ;;  %456 = vmatmul.mubr.msk.bf16.vlgmr.msra.gmra.mrb[0].mxu1 %vm77_vm2, %v519_v6  ;;  %v530_v17 = vld [vmem:[%s782_s5 + $0x30] sm:$0xff]   ;;  %v410_v21 = vld [vmem:[%s781_s4] ss:$0 sm:$0xff] }
  0x2c   :  { %445 = vmatprep.mubr.msk.bf16.mxu0 %vm607_vm0, %v606_v0  ;;  %459 = vmatprep.mubr.msk.bf16.mxu1 %vm607_vm0, %v606_v0  ;;  %v411_v62 = vld [vmem:[%s783_s6] ss:$0 sm:$0xff]  ;;  %s576_s6 = scalar_lea.vmem %s386_s27, 640 }
  0x2d   :  { %468 = vmatpush3.bf16.msra.mxu0 %v524_v7  ;;  %503 = vmatpush3.bf16.msra.mxu1 %v524_v7  ;;  %p577_p2 = scmp.ne.s32.totalorder %s386_s27, %s576_s6  ;;  %p582_p4 = scmp.lt.s32.totalorder %s576_s6, %s576_s6 }
  0x2e   :  { %469 = vmatprep.subr.bf16.mxu0 %v606_v0  ;;  %496 = vmatprep.subr.bf16.mxu1 %v606_v0 }
  0x2f   :  { %p583_p5 = por %p582_p4, %p581_p3 }
  0x31   :  { %470 = vmatpush3.bf16.msra.mxu0 %v525_v9  ;;  %504 = vmatpush3.bf16.msra.mxu1 %v525_v9  ;;  %p584_p6 = pnand %p583_p5, %p577_p2 }
  0x32   :  { %471 = vmatprep.subr.bf16.mxu0 %v606_v0  ;;  %497 = vmatprep.subr.bf16.mxu1 %v606_v0 }
  0x33   :  { %446 = vmatmul.mubr.msk.bf16.gmra.mrb[4].mxu0 %vm77_vm2, %v520_v8  ;;  %460 = vmatmul.mubr.msk.bf16.gmra.mrb[4].mxu1 %vm77_vm2, %v521_v10 }
  0x34   :  { %449 = vmatprep.mubr.msk.bf16.mxu0 %vm607_vm0, %v606_v0  ;;  %463 = vmatprep.mubr.msk.bf16.mxu1 %vm607_vm0, %v606_v0 }
  0x35   :  { %472 = vmatpush3.bf16.msra.mxu0 %v526_v11  ;;  %505 = vmatpush3.bf16.msra.mxu1 %v526_v11 }
  0x36   :  { %473 = vmatprep.subr.bf16.mxu0 %v606_v0  ;;  %498 = vmatprep.subr.bf16.mxu1 %v606_v0 }
  0x39   :  { %474 = vmatpush3.bf16.msra.mxu0 %v527_v12  ;;  %506 = vmatpush3.bf16.msra.mxu1 %v527_v12 }
  0x3a   :  { %475 = vmatprep.subr.bf16.mxu0 %v606_v0  ;;  %499 = vmatprep.subr.bf16.mxu1 %v606_v0 }
  0x3b   :  { %450 = vmatmul.mubr.msk.bf16.gmra.mrb[8].mxu0 %vm77_vm2, %v522_v13  ;;  %464 = vmatmul.mubr.msk.bf16.gmra.mrb[8].mxu1 %vm77_vm2, %v523_v14 }
  0x3c   :  { %483 = vmatprep.mubr.msk.bf16.mxu0 %vm607_vm0, %v606_v0  ;;  %487 = vmatprep.mubr.msk.bf16.mxu1 %vm607_vm0, %v606_v0 }
  0x3d   :  { %476 = vmatpush3.bf16.msra.mxu0 %v528_v15  ;;  %507 = vmatpush3.bf16.msra.mxu1 %v528_v15 }
  0x3e   :  { %477 = vmatprep.subr.bf16.mxu0 %v606_v0  ;;  %500 = vmatprep.subr.bf16.mxu1 %v606_v0 }
  0x41   :  { %478 = vmatpush3.bf16.msra.mxu0 %v529_v16  ;;  %508 = vmatpush3.bf16.msra.mxu1 %v529_v16 }
  0x42   :  { %479 = vmatprep.subr.bf16.mxu0 %v606_v0  ;;  %501 = vmatprep.subr.bf16.mxu1 %v606_v0 }
  0x45   :  { %480 = vmatpush3.bf16.msra.mxu0 %v530_v17  ;;  %509 = vmatpush3.bf16.msra.mxu1 %v530_v17 }
  0x46   :  { %481 = vmatprep.subr.bf16.mxu0 %v606_v0  ;;  %502 = vmatprep.subr.bf16.mxu1 %v606_v0 }
  0x49   :  { %482 = vmatpush3.bf16.msra.mxu0 %v531_v18  ;;  %510 = vmatpush3.bf16.msra.mxu1 %v531_v18 }
  0xfe   :  { %v125_v19 = vpop.f32.mrb[0].mxu0  ;;  %v206_v20 = vpop.f32.mrb[0].mxu1 }
  0xff   :  { %v207_v22 = vadd.f32 %v206_v20, %v125_v19  ;;  %v443_v23 = vpop.f32.mrb[1].mxu0  ;;  %v457_v24 = vpop.f32.mrb[1].mxu1 }
 0x100   :  { %v128_v25 = vpop.f32.mrb[2].mxu0  ;;  %v209_v26 = vpop.f32.mrb[2].mxu1 }
 0x101   :  { %v235_v27 = vadd.f32 %v410_v21, %v207_v22  ;;  %v210_v28 = vadd.f32 %v209_v26, %v128_v25  ;;  %v444_v29 = vpop.f32.mrb[3].mxu0  ;;  %v458_v30 = vpop.f32.mrb[3].mxu1 }
 0x103   :  { %v236_v31 = vadd.f32 %v410_v21, %v210_v28  ;;  %v240_v32 = vmax.f32 %v235_v27, 0.0 }
 0x105   :  { %v241_v33 = vmax.f32 %v236_v31, 0.0 }
 0x106   :  { %v133_v34 = vpop.f32.mrb[4].mxu0  ;;  %v214_v35 = vpop.f32.mrb[4].mxu1 }
 0x107   :  { %v245_v36 = vpack.c.bf16 %v241_v33, %v240_v32  ;;  %v215_v37 = vadd.f32 %v214_v35, %v133_v34  ;;  %v447_v38 = vpop.f32.mrb[5].mxu0  ;;  %v461_v39 = vpop.f32.mrb[5].mxu1 }
 0x108   :  { %v136_v40 = vpop.f32.mrb[6].mxu0  ;;  %v217_v41 = vpop.f32.mrb[6].mxu1 }
 0x109   :  { %v237_v42 = vadd.f32 %v410_v21, %v215_v37  ;;  %v218_v43 = vadd.f32 %v217_v41, %v136_v40  ;;  %v448_v44 = vpop.f32.mrb[7].mxu0  ;;  %v462_v45 = vpop.f32.mrb[7].mxu1  ;;  %484 = vmatmul.mubr.bf16.vlgmr.msra.gmra.mrb[12].mxu0 %v245_v36 }
 0x10b   :  { %v238_v46 = vadd.f32 %v410_v21, %v218_v43  ;;  %v242_v47 = vmax.f32 %v237_v42, 0.0 }
 0x10d   :  { %v243_v48 = vmax.f32 %v238_v46, 0.0 }
 0x10e   :  { %v141_v49 = vpop.f32.mrb[8].mxu0  ;;  %v222_v50 = vpop.f32.mrb[8].mxu1 }
 0x10f   :  { %v246_v51 = vpack.c.bf16 %v243_v48, %v242_v47  ;;  %v223_v52 = vadd.f32 %v222_v50, %v141_v49  ;;  %v451_v53 = vpop.f32.mrb[9].mxu0  ;;  %v465_v54 = vpop.f32.mrb[9].mxu1 }
 0x110   :  { %v144_v55 = vpop.f32.mrb[10].mxu0  ;;  %v225_v56 = vpop.f32.mrb[10].mxu1 }
 0x111   :  { %v239_v57 = vadd.f32 %v410_v21, %v223_v52  ;;  %v452_v58 = vpop.f32.mrb[11].mxu0  ;;  %v466_v59 = vpop.f32.mrb[11].mxu1  ;;  %488 = vmatmul.mubr.bf16.vlgmr.msra.gmra.mrb[12].mxu1 %v246_v51 }
 0x112   :  { %491 = vmatprep.mubr.msk.bf16.mxu1 %vm607_vm0, %v606_v0 }
 0x113   :  { %v244_v60 = vmax.f32 %v239_v57, 0.0 }
 0x115   :  { %v247_v61 = vpack.c.bf16 %v244_v60, %v244_v60 }
 0x119   :  { %492 = vmatmul.mubr.bf16.gmra.mrb[16].mxu1 %v247_v61 }
 0x1dc   :  { %v353_v63 = vpop.f32.mrb[12].mxu0 }
 0x1dd   :  { %v354_v1 = vadd.f32 %v411_v62, %v353_v63  ;;  %v485_v2 = vpop.f32.mrb[13].mxu0 }
 0x1de   :  { %v356_v3 = vpop.f32.mrb[14].mxu0 }
 0x1df   :  { %375 = vst [vmem:[#allocation7] sm:$0xff] %v354_v1  ;;  %v357_v4 = vadd.f32 %v411_v62, %v356_v3  ;;  %v486_v5 = vpop.f32.mrb[15].mxu0 }
 0x1e1   :  { %376 = vst [vmem:[#allocation7 + $0x8] sm:$0xff] %v357_v4 }
 0x1e4   :  { %v361_v6 = vpop.f32.mrb[12].mxu1 }
 0x1e5   :  { %v362_v7 = vadd.f32 %v411_v62, %v361_v6  ;;  %v489_v8 = vpop.f32.mrb[13].mxu1 }
 0x1e6   :  { %v364_v9 = vpop.f32.mrb[14].mxu1 }
 0x1e7   :  { %377 = vst [vmem:[#allocation7 + $0x10] sm:$0xff] %v362_v7  ;;  %v365_v0 = vadd.f32 %v411_v62, %v364_v9  ;;  %v490_v10 = vpop.f32.mrb[15].mxu1 }
 0x1e9   :  { %378 = vst [vmem:[#allocation7 + $0x18] sm:$0xff] %v365_v0 }
 0x1ec   :  { %v369_v11 = vpop.f32.mrb[16].mxu1 }
 0x1ed   :  { %v370_v12 = vadd.f32 %v411_v62, %v369_v11  ;;  %v493_v13 = vpop.f32.mrb[17].mxu1 }
 0x1ee   :  { %v372_v14 = vpop.f32.mrb[18].mxu1 }
 0x1ef   :  { %379 = vst [vmem:[#allocation7 + $0x20] sm:$0xff] %v370_v12  ;;  %v494_v15 = vpop.f32.mrb[19].mxu1 }
 0x1f0   :  { %587 = shalt.err (!%p584_p6)
}
 0x1f1   :  { %s588_s30 = scalar_lea.hbm %s784_s7, 640 }
 0x1f2   :  { %p589_p7 = scmp.ne.s32.totalorder %s784_s7, %s588_s30  ;;  %p592_p8 = scmp.lt.u32.totalorder %s588_s30, %s784_s7 }
 0x1f4   :  { %p594_p9 = pnand %p592_p8, %p589_p7 }
 0x1f6   :  { %597 = shalt.err (!%p594_p9)
}
 0x1f7   :  { %s609_s12 = smov 128   ;;  %s610_s13 = smov 8  }
 0x1f8   :  { %391 = dma.vmem_to_hbm [thread:$0]  %s386_s27, 640, %s784_s7, [#allocation4], %s609_s12, %s609_s12, %s610_s13  }
 0x1f9   :  { %602 = dma.done.wait [#allocation4], 640  }
 0x1fa   :  { %603 = vsyncadd [#allocation4], 4294966656 }
 0x1fb   :  { %395 = vsyncpa [#allocation3], 1 }
 0x1fc   :  { %396 = vsyncpa [#allocation6], 1 }
 0x1fd   :  { %397 = vsyncpa [#allocation4], 1 }

</bundles_post_ra>
